<compile_context>
chip_gen: v7x
topology: tpu7x:2x2x1
jax: 0.10.0
libtpu: 0.0.40
codegen_flags: <defaults>
</compile_context>

<pallas_src>
import jax
import jax.numpy as jnp
from jax.experimental import pallas as pl
from jax.experimental.pallas import tpu as pltpu


# ----------------------------------------------------------------------------
# Fused Pallas kernel: all cochain dimensions, one grid
# ----------------------------------------------------------------------------
def _sparse_cin_fused_kernel(xall_ref,   # (N_pad, D)   bf16  all cells of this dim
                             xrow_ref,   # (TM, D)      bf16  this row tile
                             aup_ref,    # (TM, N_pad)  bf16  up-adjacency rows
                             binc_ref,   # (TM, Nb_pad) bf16  boundary incidence rows
                             bx_ref,     # (Nb_pad, D)  bf16  boundary-cell features
                             win_ref,    # (2, D, H)    bf16  [w1_up, w1_bd]
                             whh_ref,    # (4, H, H)    bf16  [w2_up, w2_bd, wc_up, wc_bd]
                             aff_ref,    # (10, H)      f32   BN scale/shift (bias folded)
                             eps_ref,    # (2, D)       f32   (1+eps1), (1+eps2) rows
                             out_ref,    # (TM, H)      f32
                             bd_acc):    # (TM, D)      f32   scratch
    d = pl.program_id(0)

    x_all = xall_ref[...]                                  # bf16, all rows (for aggregation)
    x_row = xrow_ref[...].astype(jnp.float32)              # f32, this tile's rows

    # out_up[i] = sum_{j in up-neighbors(i)} x[j]          (msg_up_nn = xs[0])
    agg_up = jnp.dot(aup_ref[...], x_all, preferred_element_type=jnp.float32)

    # out_boundaries[i] = sum_{b in boundaries(i)} boundary_attr[b]
    # dim 0 has no boundaries -> skip the matmul entirely.
    @pl.when(d == 0)
    def _():
        bd_acc[...] = jnp.zeros_like(bd_acc)

    @pl.when(d > 0)
    def _():
        bd_acc[...] = jnp.dot(binc_ref[...], bx_ref[...],
                              preferred_element_type=jnp.float32)

    eps = eps_ref[...]                                     # (2, D) f32
    out_up = agg_up + eps[0:1, :] * x_row                  # GIN residual, (1+eps1)*x
    out_bd = bd_acc[...] + eps[1:2, :] * x_row             # (1+eps2)*x

    aff = aff_ref[...]                                     # (10, H) f32

    def mlp2(h, w1, s1, t1, w2, s2, t2):
        # Linear -> BN -> ReLU -> Linear -> BN -> ReLU (Linear biases folded into t1/t2)
        h = jnp.dot(h.astype(jnp.bfloat16), w1, preferred_element_type=jnp.float32)
        h = jnp.maximum(h * s1 + t1, 0.0)
        h = jnp.dot(h.astype(jnp.bfloat16), w2, preferred_element_type=jnp.float32)
        h = jnp.maximum(h * s2 + t2, 0.0)
        return h

    hu = mlp2(out_up, win_ref[0], aff[0:1], aff[1:2], whh_ref[0], aff[2:3], aff[3:4])
    hb = mlp2(out_bd, win_ref[1], aff[4:5], aff[5:6], whh_ref[1], aff[6:7], aff[7:8])

    # combine_nn: Linear(2H, H) on cat([hu, hb], -1) == hu @ Wc[:H] + hb @ Wc[H:]
    c = (jnp.dot(hu.astype(jnp.bfloat16), whh_ref[2], preferred_element_type=jnp.float32)
         + jnp.dot(hb.astype(jnp.bfloat16), whh_ref[3], preferred_element_type=jnp.float32))
    # TODO(synk): H=32 (<128 lanes) forces masked vst stores; if downstream layout allows,
    # pack several row tiles / dims into one lane-dense slab.
    out_ref[...] = jnp.maximum(c * aff[8:9] + aff[9:10], 0.0).astype(out_ref.dtype)


def sparse_cin_conv_forward(x_all, aup_all, binc_all, bx_all,
                            w_in, w_hh, aff, eps, *, row_tile=256):
    """Fused SparseCINConv forward over all cochain dimensions."""
    n_dims, n_pad, d_in = x_all.shape
    nb_pad = bx_all.shape[1]
    hidden = w_hh.shape[-1]
    tm = min(row_tile, n_pad)
    assert n_pad % tm == 0, "pad the cell count to a multiple of the row tile"
    grid = (n_dims, n_pad // tm)

    in_specs = [
        pl.BlockSpec((None, n_pad, d_in),   lambda d, r: (d, 0, 0)),     # x, all rows
        pl.BlockSpec((None, tm, d_in),      lambda d, r: (d, r, 0)),     # x, this row tile
        pl.BlockSpec((None, tm, n_pad),     lambda d, r: (d, r, 0)),     # up adjacency rows
        pl.BlockSpec((None, tm, nb_pad),    lambda d, r: (d, r, 0)),     # boundary incidence rows
        pl.BlockSpec((None, nb_pad, d_in),  lambda d, r: (d, 0, 0)),     # boundary features
        pl.BlockSpec((2, d_in, hidden),     lambda d, r: (d, 0, 0)),     # w_in slab (per-dim pair)
        pl.BlockSpec((4, hidden, hidden),   lambda d, r: (d, 0, 0)),     # w_hh slab (per-dim quad)
        pl.BlockSpec((None, 10, hidden),    lambda d, r: (d, 0, 0)),     # folded affine slab
        pl.BlockSpec((None, 2, d_in),       lambda d, r: (d, 0, 0)),     # (1+eps) rows
    ]
    out_specs = pl.BlockSpec((None, tm, hidden), lambda d, r: (d, r, 0))

    return pl.pallas_call(
        _sparse_cin_fused_kernel,
        out_shape=jax.ShapeDtypeStruct((n_dims, n_pad, hidden), jnp.float32),
        grid_spec=pltpu.PrefetchScalarGridSpec(
            num_scalar_prefetch=0,
            grid=grid,
            in_specs=in_specs,
            out_specs=out_specs,
            scratch_shapes=[pltpu.VMEM((tm, d_in), jnp.float32)],
        ),
        compiler_params=pltpu.CompilerParams(
            dimension_semantics=("parallel", "parallel")),
    )(x_all, x_all, aup_all, binc_all, bx_all, w_in, w_hh, aff, eps)


# ----------------------------------------------------------------------------
# Plain-JAX glue: parameter construction, packing, dense aggregation matrices
# ----------------------------------------------------------------------------
def _init_linear(key, d_in, d_out):
    kw, kb = jax.random.split(key)
    bound = float(d_in) ** -0.5
    w = jax.random.uniform(kw, (d_in, d_out), jnp.float32, -bound, bound)
    b = jax.random.uniform(kb, (d_out,), jnp.float32, -bound, bound)
    return w, b


def _init_bn(key, dim, bn_eps=1e-5):
    k1, k2, k3, k4 = jax.random.split(key, 4)
    gamma = 1.0 + 0.1 * jax.random.normal(k1, (dim,), jnp.float32)
    beta = 0.1 * jax.random.normal(k2, (dim,), jnp.float32)
    mean = 0.1 * jax.random.normal(k3, (dim,), jnp.float32)
    var = jnp.abs(1.0 + 0.1 * jax.random.normal(k4, (dim,), jnp.float32))
    scale = gamma / jnp.sqrt(var + bn_eps)
    shift = beta - mean * scale
    return scale, shift


def init_level_params(key, d_in, hidden):
    ks = jax.random.split(key, 10)
    p = {}
    p["w1u"], p["b1u"] = _init_linear(ks[0], d_in, hidden)
    p["s1u"], p["t1u"] = _init_bn(ks[1], hidden)
    p["w2u"], p["b2u"] = _init_linear(ks[2], hidden, hidden)
    p["s2u"], p["t2u"] = _init_bn(ks[3], hidden)
    p["w1b"], p["b1b"] = _init_linear(ks[4], d_in, hidden)
    p["s1b"], p["t1b"] = _init_bn(ks[5], hidden)
    p["w2b"], p["b2b"] = _init_linear(ks[6], hidden, hidden)
    p["s2b"], p["t2b"] = _init_bn(ks[7], hidden)
    p["wc"], p["bc"] = _init_linear(ks[8], 2 * hidden, hidden)
    p["sc"], p["tc"] = _init_bn(ks[9], hidden)
    return p


def pack_level_params(levels, hidden):
    """Pack per-level weights into contiguous slabs (bias folded into BN shift)."""
    w_in = jnp.concatenate(
        [jnp.stack([p["w1u"], p["w1b"]]) for p in levels], axis=0)          # (n*2, D, H)
    w_hh = jnp.concatenate(
        [jnp.stack([p["w2u"], p["w2b"], p["wc"][:hidden], p["wc"][hidden:]])
         for p in levels], axis=0)                                          # (n*4, H, H)

    def fold(p):
        rows = []
        for s, t, b in ((p["s1u"], p["t1u"], p["b1u"]),
                        (p["s2u"], p["t2u"], p["b2u"]),
                        (p["s1b"], p["t1b"], p["b1b"]),
                        (p["s2b"], p["t2b"], p["b2b"]),
                        (p["sc"], p["tc"], p["bc"])):
            rows.append(s)
            rows.append(b * s + t)     # fold Linear bias into the BN shift
        return jnp.stack(rows)         # (10, H): s1,t1', s2,t2', s1b,t1b', s2b,t2b', sc,tc'

    aff = jnp.stack([fold(p) for p in levels]).astype(jnp.float32)          # (n, 10, H)
    return w_in.astype(jnp.bfloat16), w_hh.astype(jnp.bfloat16), aff


def densify(index_src, index_dst, n_rows, n_cols):
    """Dense sum-aggregation matrix A with A[dst, src] += 1 (PyG scatter-add)."""
    a = jnp.zeros((n_rows, n_cols), jnp.float32)
    return a.at[index_dst, index_src].add(1.0)


def reference_level(x, a_up, b_inc, bx, p, eps1, eps2, hidden, quantize):
    """Pure-JAX mirror of one SparseCINCochainConv (optionally mimicking bf16 inputs)."""
    q = (lambda a: a.astype(jnp.bfloat16).astype(jnp.float32)) if quantize else (lambda a: a)
    xq, aq, bq, bxq = q(x), q(a_up), q(b_inc), q(bx)
    out_up = aq @ xq + (1.0 + eps1) * xq
    out_bd = bq @ bxq + (1.0 + eps2) * xq

    def mlp2(h, w1, b1, s1, t1, w2, b2, s2, t2):
        h = jnp.maximum((q(h) @ q(w1) + b1) * s1 + t1, 0.0)
        h = jnp.maximum((q(h) @ q(w2) + b2) * s2 + t2, 0.0)
        return h

    hu = mlp2(out_up, p["w1u"], p["b1u"], p["s1u"], p["t1u"],
              p["w2u"], p["b2u"], p["s2u"], p["t2u"])
    hb = mlp2(out_bd, p["w1b"], p["b1b"], p["s1b"], p["t1b"],
              p["w2b"], p["b2b"], p["s2b"], p["t2b"])
    c = q(hu) @ q(p["wc"][:hidden]) + q(hb) @ q(p["wc"][hidden:]) + p["bc"]
    return jnp.maximum(c * p["sc"] + p["tc"], 0.0)


def _round_up(n, m):
    return ((n + m - 1) // m) * m


# ----------------------------------------------------------------------------
# main
# ----------------------------------------------------------------------------
if __name__ == "__main__":
    key = jax.random.PRNGKey(0)
    layer_dim = 32       # up_msg_size == boundary_msg_size == layer_dim
    hidden = 32
    max_dim = 2
    eps_val = 0.0
    n_cells = [16, 24, 8]            # vertices, edges, 2-cells
    n_dims = max_dim + 1

    keys = jax.random.split(key, 16)

    # Cochain features per dimension.
    xs = [jax.random.normal(keys[d], (n_cells[d], layer_dim), jnp.float32)
          for d in range(n_dims)]

    # Upper-adjacency (none for the top dimension).
    n_up_edges = [48, 32, 0]
    a_ups = []
    for d in range(n_dims):
        if n_up_edges[d] == 0:
            a_ups.append(jnp.zeros((n_cells[d], n_cells[d]), jnp.float32))
        else:
            src = jax.random.randint(keys[3 + d], (n_up_edges[d],), 0, n_cells[d])
            dst = jax.random.randint(keys[6 + d], (n_up_edges[d],), 0, n_cells[d])
            a_ups.append(densify(src, dst, n_cells[d], n_cells[d]))

    # Boundary incidence + boundary features (none for dim 0, like CWN).
    b_incs, bxs = [], []
    for d in range(n_dims):
        if d == 0:
            nb = 8   # dummy width; incidence is all-zero so the boundary message is 0
            b_incs.append(jnp.zeros((n_cells[0], nb), jnp.float32))
            bxs.append(jnp.zeros((nb, layer_dim), jnp.float32))
        else:
            n_b = (2 if d == 1 else 3) * n_cells[d]
            src = jax.random.randint(keys[9 + d], (n_b,), 0, n_cells[d - 1])
            dst = jax.random.randint(keys[12 + d], (n_b,), 0, n_cells[d])
            b_incs.append(densify(src, dst, n_cells[d], n_cells[d - 1]))
            bxs.append(xs[d - 1])    # boundary_attr = features of the (d-1)-cells

    # Per-level parameters (ModuleList: independent weights per dimension).
    pkeys = jax.random.split(jax.random.PRNGKey(1), n_dims)
    params = [init_level_params(pkeys[d], layer_dim, hidden) for d in range(n_dims)]

    # ---- pack / pad everything into per-dim stacked slabs ----------------------
    n_pad = _round_up(max(n_cells), 8)
    nb_pad = _round_up(max(b.shape[1] for b in b_incs), 8)

    def pad2(a, r, c):
        return jnp.pad(a, ((0, r - a.shape[0]), (0, c - a.shape[1])))

    x_all = jnp.stack([pad2(xs[d], n_pad, layer_dim) for d in range(n_dims)]
                      ).astype(jnp.bfloat16)
    aup_all = jnp.stack([pad2(a_ups[d], n_pad, n_pad) for d in range(n_dims)]
                        ).astype(jnp.bfloat16)
    binc_all = jnp.stack([pad2(b_incs[d], n_pad, nb_pad) for d in range(n_dims)]
                         ).astype(jnp.bfloat16)
    bx_all = jnp.stack([pad2(bxs[d], nb_pad, layer_dim) for d in range(n_dims)]
                       ).astype(jnp.bfloat16)

    w_in, w_hh, aff = pack_level_params(params, hidden)
    eps_rows = jnp.broadcast_to(
        jnp.array([[1.0 + eps_val], [1.0 + eps_val]], jnp.float32), (2, layer_dim))
    eps_all = jnp.stack([eps_rows] * n_dims)

    # ---- run the fused kernel ---------------------------------------------------
    out_all = sparse_cin_conv_forward(x_all, aup_all, binc_all, bx_all,
                                      w_in, w_hh, aff, eps_all)
    out_all = jax.block_until_ready(out_all)

    # ---- correctness checks ------------------------------------------------------
    for d in range(n_dims):
        got = out_all[d, :n_cells[d], :]
        assert got.shape == (n_cells[d], hidden)
        # Reference that mimics the kernel's bf16 matmul inputs (tight tolerance).
        ref_bf16 = reference_level(xs[d], a_ups[d], b_incs[d], bxs[d], params[d],
                                   eps_val, eps_val, hidden, quantize=True)
        assert jnp.allclose(got, ref_bf16, rtol=1e-2, atol=1e-2), \
            f"mismatch vs bf16-mimic reference at dim {d}"
        # Full-f32 reference (loose tolerance: matmul inputs are bf16 by design).
        ref_f32 = reference_level(xs[d], a_ups[d], b_incs[d], bxs[d], params[d],
                                  eps_val, eps_val, hidden, quantize=False)
        assert jnp.allclose(got, ref_f32, rtol=1e-1, atol=1e-1), \
            f"mismatch vs f32 reference at dim {d}"

    print("KERNEL_OK")
</pallas_src>

<mosaic_0001>
module attributes {stable_mosaic.version = 11 : i64} {
  func.func @_sparse_cin_fused_kernel(%arg0: i32, %arg1: i32, %arg2: memref<1x24x32xbf16, #tpu.memory_space<vmem>>, %arg3: memref<1x24x32xbf16, #tpu.memory_space<vmem>>, %arg4: memref<1x24x24xbf16, #tpu.memory_space<vmem>>, %arg5: memref<1x24x24xbf16, #tpu.memory_space<vmem>>, %arg6: memref<1x24x32xbf16, #tpu.memory_space<vmem>>, %arg7: memref<2x32x32xbf16, #tpu.memory_space<vmem>>, %arg8: memref<4x32x32xbf16, #tpu.memory_space<vmem>>, %arg9: memref<1x10x32xf32, #tpu.memory_space<vmem>>, %arg10: memref<1x2x32xf32, #tpu.memory_space<vmem>>, %arg11: memref<1x24x32xf32, #tpu.memory_space<vmem>>, %arg12: memref<24x32xf32, #tpu.memory_space<vmem>>) attributes {dimension_semantics = [#tpu.dimension_semantics<parallel>, #tpu.dimension_semantics<parallel>], iteration_bounds = array<i64: 3, 1>, scalar_prefetch = 0 : i64, scratch_operands = 1 : i64, tpu.core_type = #tpu.core_type<tc>, window_params = [{transform_indices = @transform_0, window_bounds = array<i64: 1, 24, 32>}, {transform_indices = @transform_1, window_bounds = array<i64: 1, 24, 32>}, {transform_indices = @transform_2, window_bounds = array<i64: 1, 24, 24>}, {transform_indices = @transform_3, window_bounds = array<i64: 1, 24, 24>}, {transform_indices = @transform_4, window_bounds = array<i64: 1, 24, 32>}, {transform_indices = @transform_5, window_bounds = array<i64: 2, 32, 32>}, {transform_indices = @transform_6, window_bounds = array<i64: 4, 32, 32>}, {transform_indices = @transform_7, window_bounds = array<i64: 1, 10, 32>}, {transform_indices = @transform_8, window_bounds = array<i64: 1, 2, 32>}, {transform_indices = @transform_9, window_bounds = array<i64: 1, 24, 32>}]} {
    %c0 = arith.constant 0 : index
    %c0_0 = arith.constant 0 : index
    %c0_1 = arith.constant 0 : index
    %0 = vector.load %arg2[%c0, %c0_0, %c0_1] : memref<1x24x32xbf16, #tpu.memory_space<vmem>>, vector<1x24x32xbf16>
    %1 = vector.shape_cast %0 : vector<1x24x32xbf16> to vector<24x32xbf16>
    %c0_2 = arith.constant 0 : index
    %c0_3 = arith.constant 0 : index
    %c0_4 = arith.constant 0 : index
    %2 = vector.load %arg3[%c0_2, %c0_3, %c0_4] : memref<1x24x32xbf16, #tpu.memory_space<vmem>>, vector<1x24x32xbf16>
    %3 = vector.shape_cast %2 : vector<1x24x32xbf16> to vector<24x32xbf16>
    %4 = arith.extf %3 : vector<24x32xbf16> to vector<24x32xf32>
    %c0_5 = arith.constant 0 : index
    %c0_6 = arith.constant 0 : index
    %c0_7 = arith.constant 0 : index
    %5 = vector.load %arg4[%c0_5, %c0_6, %c0_7] : memref<1x24x24xbf16, #tpu.memory_space<vmem>>, vector<1x24x24xbf16>
    %6 = vector.shape_cast %5 : vector<1x24x24xbf16> to vector<24x24xbf16>
    %cst = arith.constant dense<0.000000e+00> : vector<24x32xf32>
    %7 = tpu.matmul %6, %1, %cst {dimension_numbers = #tpu.dot_dimension_numbers<[1], [0], [0], [1], [0, 0, 1, 1], [], []>} : vector<24x24xbf16>, vector<24x32xbf16>, vector<24x32xf32> -> vector<24x32xf32>
    %c0_i32 = arith.constant 0 : i32
    %8 = arith.cmpi eq, %arg0, %c0_i32 : i32
    %9 = arith.extui %8 : i1 to i32
    %c0_i32_8 = arith.constant 0 : i32
    %10 = arith.cmpi ne, %9, %c0_i32_8 : i32
    scf.if %10 {
      %cst_48 = arith.constant 0.000000e+00 : f32
      %95 = vector.broadcast %cst_48 : f32 to vector<24x32xf32>
      %c0_49 = arith.constant 0 : index
      %c0_50 = arith.constant 0 : index
      %96 = vector.load %arg12[%c0_49, %c0_50] : memref<24x32xf32, #tpu.memory_space<vmem>>, vector<24x32xf32>
      tpu.vector_store %arg12[%c0_49, %c0_50], %95 {strides = array<i32>} : memref<24x32xf32, #tpu.memory_space<vmem>>, vector<24x32xf32>,
    } else {
    }
    %c0_i32_9 = arith.constant 0 : i32
    %11 = arith.cmpi sgt, %arg0, %c0_i32_9 : i32
    %12 = arith.extui %11 : i1 to i32
    %c0_i32_10 = arith.constant 0 : i32
    %13 = arith.cmpi ne, %12, %c0_i32_10 : i32
    scf.if %13 {
      %c0_48 = arith.constant 0 : index
      %c0_49 = arith.constant 0 : index
      %c0_50 = arith.constant 0 : index
      %95 = vector.load %arg5[%c0_48, %c0_49, %c0_50] : memref<1x24x24xbf16, #tpu.memory_space<vmem>>, vector<1x24x24xbf16>
      %96 = vector.shape_cast %95 : vector<1x24x24xbf16> to vector<24x24xbf16>
      %c0_51 = arith.constant 0 : index
      %c0_52 = arith.constant 0 : index
      %c0_53 = arith.constant 0 : index
      %97 = vector.load %arg6[%c0_51, %c0_52, %c0_53] : memref<1x24x32xbf16, #tpu.memory_space<vmem>>, vector<1x24x32xbf16>
      %98 = vector.shape_cast %97 : vector<1x24x32xbf16> to vector<24x32xbf16>
      %cst_54 = arith.constant dense<0.000000e+00> : vector<24x32xf32>
      %99 = tpu.matmul %96, %98, %cst_54 {dimension_numbers = #tpu.dot_dimension_numbers<[1], [0], [0], [1], [0, 0, 1, 1], [], []>} : vector<24x24xbf16>, vector<24x32xbf16>, vector<24x32xf32> -> vector<24x32xf32>
      %c0_55 = arith.constant 0 : index
      %c0_56 = arith.constant 0 : index
      %100 = vector.load %arg12[%c0_55, %c0_56] : memref<24x32xf32, #tpu.memory_space<vmem>>, vector<24x32xf32>
      tpu.vector_store %arg12[%c0_55, %c0_56], %99 {strides = array<i32>} : memref<24x32xf32, #tpu.memory_space<vmem>>, vector<24x32xf32>,
    } else {
    }
    %c0_11 = arith.constant 0 : index
    %c0_12 = arith.constant 0 : index
    %c0_13 = arith.constant 0 : index
    %14 = vector.load %arg10[%c0_11, %c0_12, %c0_13] : memref<1x2x32xf32, #tpu.memory_space<vmem>>, vector<1x2x32xf32>
    %15 = vector.shape_cast %14 : vector<1x2x32xf32> to vector<2x32xf32>
    %16 = vector.extract_strided_slice %15 {offsets = [0, 0], sizes = [1, 32], strides = [1, 1]} : vector<2x32xf32> to vector<1x32xf32>
    %17 = vector.broadcast %16 : vector<1x32xf32> to vector<24x32xf32>
    %18 = arith.mulf %17, %4 : vector<24x32xf32>
    %19 = arith.addf %7, %18 : vector<24x32xf32>
    %c0_14 = arith.constant 0 : index
    %c0_15 = arith.constant 0 : index
    %20 = vector.load %arg12[%c0_14, %c0_15] : memref<24x32xf32, #tpu.memory_space<vmem>>, vector<24x32xf32>
    %21 = vector.extract_strided_slice %15 {offsets = [1, 0], sizes = [1, 32], strides = [1, 1]} : vector<2x32xf32> to vector<1x32xf32>
    %22 = vector.broadcast %21 : vector<1x32xf32> to vector<24x32xf32>
    %23 = arith.mulf %22, %4 : vector<24x32xf32>
    %24 = arith.addf %20, %23 : vector<24x32xf32>
    %c0_16 = arith.constant 0 : index
    %c0_17 = arith.constant 0 : index
    %c0_18 = arith.constant 0 : index
    %25 = vector.load %arg9[%c0_16, %c0_17, %c0_18] : memref<1x10x32xf32, #tpu.memory_space<vmem>>, vector<1x10x32xf32>
    %26 = vector.shape_cast %25 : vector<1x10x32xf32> to vector<10x32xf32>
    %c0_19 = arith.constant 0 : index
    %c0_20 = arith.constant 0 : index
    %c0_21 = arith.constant 0 : index
    %27 = vector.load %arg7[%c0_19, %c0_20, %c0_21] : memref<2x32x32xbf16, #tpu.memory_space<vmem>>, vector<1x32x32xbf16>
    %28 = vector.shape_cast %27 : vector<1x32x32xbf16> to vector<32x32xbf16>
    %29 = vector.extract_strided_slice %26 {offsets = [0, 0], sizes = [1, 32], strides = [1, 1]} : vector<10x32xf32> to vector<1x32xf32>
    %30 = vector.extract_strided_slice %26 {offsets = [1, 0], sizes = [1, 32], strides = [1, 1]} : vector<10x32xf32> to vector<1x32xf32>
    %c0_22 = arith.constant 0 : index
    %c0_23 = arith.constant 0 : index
    %c0_24 = arith.constant 0 : index
    %31 = vector.load %arg8[%c0_22, %c0_23, %c0_24] : memref<4x32x32xbf16, #tpu.memory_space<vmem>>, vector<1x32x32xbf16>
    %32 = vector.shape_cast %31 : vector<1x32x32xbf16> to vector<32x32xbf16>
    %33 = vector.extract_strided_slice %26 {offsets = [2, 0], sizes = [1, 32], strides = [1, 1]} : vector<10x32xf32> to vector<1x32xf32>
    %34 = vector.extract_strided_slice %26 {offsets = [3, 0], sizes = [1, 32], strides = [1, 1]} : vector<10x32xf32> to vector<1x32xf32>
    %35 = arith.truncf %19 : vector<24x32xf32> to vector<24x32xbf16>
    %cst_25 = arith.constant dense<0.000000e+00> : vector<24x32xf32>
    %36 = tpu.matmul %35, %28, %cst_25 {dimension_numbers = #tpu.dot_dimension_numbers<[1], [0], [0], [1], [0, 0, 1, 1], [], []>} : vector<24x32xbf16>, vector<32x32xbf16>, vector<24x32xf32> -> vector<24x32xf32>
    %37 = vector.broadcast %29 : vector<1x32xf32> to vector<24x32xf32>
    %38 = arith.mulf %36, %37 : vector<24x32xf32>
    %39 = vector.broadcast %30 : vector<1x32xf32> to vector<24x32xf32>
    %40 = arith.addf %38, %39 : vector<24x32xf32>
    %cst_26 = arith.constant 0.000000e+00 : f32
    %41 = vector.broadcast %cst_26 : f32 to vector<24x32xf32>
    %42 = arith.maximumf %40, %41 : vector<24x32xf32>
    %43 = arith.truncf %42 : vector<24x32xf32> to vector<24x32xbf16>
    %cst_27 = arith.constant dense<0.000000e+00> : vector<24x32xf32>
    %44 = tpu.matmul %43, %32, %cst_27 {dimension_numbers = #tpu.dot_dimension_numbers<[1], [0], [0], [1], [0, 0, 1, 1], [], []>} : vector<24x32xbf16>, vector<32x32xbf16>, vector<24x32xf32> -> vector<24x32xf32>
    %45 = vector.broadcast %33 : vector<1x32xf32> to vector<24x32xf32>
    %46 = arith.mulf %44, %45 : vector<24x32xf32>
    %47 = vector.broadcast %34 : vector<1x32xf32> to vector<24x32xf32>
    %48 = arith.addf %46, %47 : vector<24x32xf32>
    %cst_28 = arith.constant 0.000000e+00 : f32
    %49 = vector.broadcast %cst_28 : f32 to vector<24x32xf32>
    %50 = arith.maximumf %48, %49 : vector<24x32xf32>
    %c1 = arith.constant 1 : index
    %c0_29 = arith.constant 0 : index
    %c0_30 = arith.constant 0 : index
    %51 = vector.load %arg7[%c1, %c0_29, %c0_30] : memref<2x32x32xbf16, #tpu.memory_space<vmem>>, vector<1x32x32xbf16>
    %52 = vector.shape_cast %51 : vector<1x32x32xbf16> to vector<32x32xbf16>
    %53 = vector.extract_strided_slice %26 {offsets = [4, 0], sizes = [1, 32], strides = [1, 1]} : vector<10x32xf32> to vector<1x32xf32>
    %54 = vector.extract_strided_slice %26 {offsets = [5, 0], sizes = [1, 32], strides = [1, 1]} : vector<10x32xf32> to vector<1x32xf32>
    %c1_31 = arith.constant 1 : index
    %c0_32 = arith.constant 0 : index
    %c0_33 = arith.constant 0 : index
    %55 = vector.load %arg8[%c1_31, %c0_32, %c0_33] : memref<4x32x32xbf16, #tpu.memory_space<vmem>>, vector<1x32x32xbf16>
    %56 = vector.shape_cast %55 : vector<1x32x32xbf16> to vector<32x32xbf16>
    %57 = vector.extract_strided_slice %26 {offsets = [6, 0], sizes = [1, 32], strides = [1, 1]} : vector<10x32xf32> to vector<1x32xf32>
    %58 = vector.extract_strided_slice %26 {offsets = [7, 0], sizes = [1, 32], strides = [1, 1]} : vector<10x32xf32> to vector<1x32xf32>
    %59 = arith.truncf %24 : vector<24x32xf32> to vector<24x32xbf16>
    %cst_34 = arith.constant dense<0.000000e+00> : vector<24x32xf32>
    %60 = tpu.matmul %59, %52, %cst_34 {dimension_numbers = #tpu.dot_dimension_numbers<[1], [0], [0], [1], [0, 0, 1, 1], [], []>} : vector<24x32xbf16>, vector<32x32xbf16>, vector<24x32xf32> -> vector<24x32xf32>
    %61 = vector.broadcast %53 : vector<1x32xf32> to vector<24x32xf32>
    %62 = arith.mulf %60, %61 : vector<24x32xf32>
    %63 = vector.broadcast %54 : vector<1x32xf32> to vector<24x32xf32>
    %64 = arith.addf %62, %63 : vector<24x32xf32>
    %cst_35 = arith.constant 0.000000e+00 : f32
    %65 = vector.broadcast %cst_35 : f32 to vector<24x32xf32>
    %66 = arith.maximumf %64, %65 : vector<24x32xf32>
    %67 = arith.truncf %66 : vector<24x32xf32> to vector<24x32xbf16>
    %cst_36 = arith.constant dense<0.000000e+00> : vector<24x32xf32>
    %68 = tpu.matmul %67, %56, %cst_36 {dimension_numbers = #tpu.dot_dimension_numbers<[1], [0], [0], [1], [0, 0, 1, 1], [], []>} : vector<24x32xbf16>, vector<32x32xbf16>, vector<24x32xf32> -> vector<24x32xf32>
    %69 = vector.broadcast %57 : vector<1x32xf32> to vector<24x32xf32>
    %70 = arith.mulf %68, %69 : vector<24x32xf32>
    %71 = vector.broadcast %58 : vector<1x32xf32> to vector<24x32xf32>
    %72 = arith.addf %70, %71 : vector<24x32xf32>
    %cst_37 = arith.constant 0.000000e+00 : f32
    %73 = vector.broadcast %cst_37 : f32 to vector<24x32xf32>
    %74 = arith.maximumf %72, %73 : vector<24x32xf32>
    %75 = arith.truncf %50 : vector<24x32xf32> to vector<24x32xbf16>
    %c2 = arith.constant 2 : index
    %c0_38 = arith.constant 0 : index
    %c0_39 = arith.constant 0 : index
    %76 = vector.load %arg8[%c2, %c0_38, %c0_39] : memref<4x32x32xbf16, #tpu.memory_space<vmem>>, vector<1x32x32xbf16>
    %77 = vector.shape_cast %76 : vector<1x32x32xbf16> to vector<32x32xbf16>
    %cst_40 = arith.constant dense<0.000000e+00> : vector<24x32xf32>
    %78 = tpu.matmul %75, %77, %cst_40 {dimension_numbers = #tpu.dot_dimension_numbers<[1], [0], [0], [1], [0, 0, 1, 1], [], []>} : vector<24x32xbf16>, vector<32x32xbf16>, vector<24x32xf32> -> vector<24x32xf32>
    %79 = arith.truncf %74 : vector<24x32xf32> to vector<24x32xbf16>
    %c3 = arith.constant 3 : index
    %c0_41 = arith.constant 0 : index
    %c0_42 = arith.constant 0 : index
    %80 = vector.load %arg8[%c3, %c0_41, %c0_42] : memref<4x32x32xbf16, #tpu.memory_space<vmem>>, vector<1x32x32xbf16>
    %81 = vector.shape_cast %80 : vector<1x32x32xbf16> to vector<32x32xbf16>
    %cst_43 = arith.constant dense<0.000000e+00> : vector<24x32xf32>
    %82 = tpu.matmul %79, %81, %cst_43 {dimension_numbers = #tpu.dot_dimension_numbers<[1], [0], [0], [1], [0, 0, 1, 1], [], []>} : vector<24x32xbf16>, vector<32x32xbf16>, vector<24x32xf32> -> vector<24x32xf32>
    %83 = arith.addf %78, %82 : vector<24x32xf32>
    %84 = vector.extract_strided_slice %26 {offsets = [8, 0], sizes = [1, 32], strides = [1, 1]} : vector<10x32xf32> to vector<1x32xf32>
    %85 = vector.broadcast %84 : vector<1x32xf32> to vector<24x32xf32>
    %86 = arith.mulf %83, %85 : vector<24x32xf32>
    %87 = vector.extract_strided_slice %26 {offsets = [9, 0], sizes = [1, 32], strides = [1, 1]} : vector<10x32xf32> to vector<1x32xf32>
    %88 = vector.broadcast %87 : vector<1x32xf32> to vector<24x32xf32>
    %89 = arith.addf %86, %88 : vector<24x32xf32>
    %cst_44 = arith.constant 0.000000e+00 : f32
    %90 = vector.broadcast %cst_44 : f32 to vector<24x32xf32>
    %91 = arith.maximumf %89, %90 : vector<24x32xf32>
    %c0_45 = arith.constant 0 : index
    %c0_46 = arith.constant 0 : index
    %c0_47 = arith.constant 0 : index
    %92 = vector.load %arg11[%c0_45, %c0_46, %c0_47] : memref<1x24x32xf32, #tpu.memory_space<vmem>>, vector<1x24x32xf32>
    %93 = vector.shape_cast %92 : vector<1x24x32xf32> to vector<24x32xf32>
    %94 = vector.shape_cast %91 : vector<24x32xf32> to vector<1x24x32xf32>
    tpu.vector_store %arg11[%c0_45, %c0_46, %c0_47], %94 {strides = array<i32>} : memref<1x24x32xf32, #tpu.memory_space<vmem>>, vector<1x24x32xf32>,
    return
  }
  func.func @transform_0(%arg0: i32, %arg1: i32) -> (i32, i32, i32) {
    %c0_i32 = arith.constant 0 : i32
    %c0_i32_0 = arith.constant 0 : i32
    %c0_i32_1 = arith.constant 0 : i32
    return %arg0, %c0_i32, %c0_i32_0 : i32, i32, i32
  }
  func.func @transform_1(%arg0: i32, %arg1: i32) -> (i32, i32, i32) {
    %c0_i32 = arith.constant 0 : i32
    %c0_i32_0 = arith.constant 0 : i32
    return %arg0, %arg1, %c0_i32 : i32, i32, i32
  }
  func.func @transform_2(%arg0: i32, %arg1: i32) -> (i32, i32, i32) {
    %c0_i32 = arith.constant 0 : i32
    %c0_i32_0 = arith.constant 0 : i32
    return %arg0, %arg1, %c0_i32 : i32, i32, i32
  }
  func.func @transform_3(%arg0: i32, %arg1: i32) -> (i32, i32, i32) {
    %c0_i32 = arith.constant 0 : i32
    %c0_i32_0 = arith.constant 0 : i32
    return %arg0, %arg1, %c0_i32 : i32, i32, i32
  }
  func.func @transform_4(%arg0: i32, %arg1: i32) -> (i32, i32, i32) {
    %c0_i32 = arith.constant 0 : i32
    %c0_i32_0 = arith.constant 0 : i32
    %c0_i32_1 = arith.constant 0 : i32
    return %arg0, %c0_i32, %c0_i32_0 : i32, i32, i32
  }
  func.func @transform_5(%arg0: i32, %arg1: i32) -> (i32, i32, i32) {
    %c0_i32 = arith.constant 0 : i32
    %c0_i32_0 = arith.constant 0 : i32
    %c0_i32_1 = arith.constant 0 : i32
    return %arg0, %c0_i32, %c0_i32_0 : i32, i32, i32
  }
  func.func @transform_6(%arg0: i32, %arg1: i32) -> (i32, i32, i32) {
    %c0_i32 = arith.constant 0 : i32
    %c0_i32_0 = arith.constant 0 : i32
    %c0_i32_1 = arith.constant 0 : i32
    return %arg0, %c0_i32, %c0_i32_0 : i32, i32, i32
  }
  func.func @transform_7(%arg0: i32, %arg1: i32) -> (i32, i32, i32) {
    %c0_i32 = arith.constant 0 : i32
    %c0_i32_0 = arith.constant 0 : i32
    %c0_i32_1 = arith.constant 0 : i32
    return %arg0, %c0_i32, %c0_i32_0 : i32, i32, i32
  }
  func.func @transform_8(%arg0: i32, %arg1: i32) -> (i32, i32, i32) {
    %c0_i32 = arith.constant 0 : i32
    %c0_i32_0 = arith.constant 0 : i32
    %c0_i32_1 = arith.constant 0 : i32
    return %arg0, %c0_i32, %c0_i32_0 : i32, i32, i32
  }
  func.func @transform_9(%arg0: i32, %arg1: i32) -> (i32, i32, i32) {
    %c0_i32 = arith.constant 0 : i32
    %c0_i32_0 = arith.constant 0 : i32
    return %arg0, %arg1, %c0_i32 : i32, i32, i32
  }
}

</mosaic_0001>

<bundles_post_ra>
// kernel: tpu_custom_call.1
= control target key start
LH: loop header
LB: loop body
LE: loop exit
PB: predicated region body
PF: predicated region fallthrough
CT: control target
= control target key end

     0   :  { %s2798_s0 = inlined_call_operand.hbm [shape: bf16[3,24,32], index: 0, kind: input, shape index: {}]   ;;  %s2799_s1 = inlined_call_operand.hbm [shape: bf16[3,24,32], index: 1, kind: input, shape index: {}]   ;;  %s2800_s2 = inlined_call_operand.hbm [shape: bf16[3,24,24], index: 2, kind: input, shape index: {}]   ;;  %s2801_s3 = inlined_call_operand.hbm [shape: bf16[3,24,24], index: 3, kind: input, shape index: {}]   ;;  %s2802_s4 = inlined_call_operand.hbm [shape: bf16[3,24,32], index: 4, kind: input, shape index: {}]   ;;  %s2803_s5 = inlined_call_operand.vmem [shape: bf16[6,32,32], index: 5, kind: input, shape index: {}]   ;;  %s2804_s6 = inlined_call_operand.hbm [shape: bf16[12,32,32], index: 6, kind: input, shape index: {}]   ;;  %s2805_s7 = inlined_call_operand.vmem [shape: f32[3,10,32], index: 7, kind: input, shape index: {}]   ;;  %s2806_s8 = inlined_call_operand.vmem [shape: f32[3,2,32], index: 8, kind: input, shape index: {}]   ;;  %s2807_s9 = inlined_call_operand.hbm [shape: f32[3,24,32], index: 9, kind: output, shape index: {}]  }
   0x1   :  { %2824 = sst [smem:[#allocation27_spill]] %s2799_s1 }
   0x2   :  { %2825 = sst [smem:[#allocation28_spill]] %s2801_s3 }
   0x3   :  { %2826 = sst [smem:[#allocation29_spill]] %s2806_s8 }
   0x4   :  { %2827 = sst [smem:[#allocation30_spill]] %s2807_s9 }
   0x5   :  { %14 = vsyncpa [#allocation4], 0 }
   0x6   :  { %16 = vsyncpa [#allocation4 + $0x1], 0 }
   0x7   :  { %17 = vsyncpa [#allocation7], 0 }
   0x8   :  { %19 = vsyncpa [#allocation7 + $0x1], 0 }
   0x9   :  { %20 = vsyncpa [#allocation10], 0 }
   0xa   :  { %22 = vsyncpa [#allocation10 + $0x1], 0 }
   0xb   :  { %23 = vsyncpa [#allocation13], 0 }
   0xc   :  { %25 = vsyncpa [#allocation13 + $0x1], 0 }
   0xd   :  { %26 = vsyncpa [#allocation5], 0 }
   0xe   :  { %28 = vsyncpa [#allocation5 + $0x1], 0  ;;  %s2275_s30 = smov 0   ;;  %s2277_s10 = smov 0  }
   0xf   :  { %s2279_s11 = smov 0   ;;  %s2281_s12 = smov 0  }
  0x10   :  { %s2283_s13 = smov 0   ;;  %s2285_s14 = smov 0  }
  0x11 LB: > { %2828 = sst [smem:[#allocation20_spill]] %s2191_s30  ;;  %s2306_s15 = sadd.s32 4294967295, %s2211_s14   ;;  %s2211_s14 = sphi %s2285_s14, %s34_s14   ;;  %s2207_s13 = sphi %s2283_s13, %s2865_s13   ;;  %s2203_s12 = sphi %s2281_s12, %s2864_s12   ;;  %s2199_s11 = sphi %s2279_s11, %s2860_s11   ;;  %s2195_s10 = sphi %s2277_s10, %s2863_s10   ;;  %s2191_s30 = sphi %s2275_s30, %s2862_s30  }
  0x12   : > { %2829 = sst [smem:[#allocation21_spill]] %s2199_s11  ;;  %s1629_s16 = sadd.s32 4294967294, %s2211_s14  }
  0x13   : > { %2830 = sst [smem:[#allocation22_spill]] %s2211_s14  ;;  %s46_s17 = sadd.s32 1, %s2207_s13 }
  0x14   : > { %s53_s18 = sadd.s32 1, %s2199_s11  ;;  %p48_p0 = scmp.ge.s32.totalorder %s46_s17, 3 }
  0x15   : > { %p60_p1 = scmp.ne.s32.totalorder %s2199_s11, %s2195_s10  ;;  %p61_p2 = scmp.eq.s32.totalorder %s2211_s14, 0 }
  0x16   : > { %p66_p3 = scmp.ne.s32.totalorder %s2195_s10, %s2191_s30  ;;  %s2867_s17 = smov (%p48_p0, %s46_s17), 0 }
  0x17   : > { %2831 = sst [smem:[#allocation23_spill]] %s2867_s17  ;;  %p2318_p4 = por %p61_p2, %p60_p1 }
  0x18   : > { %p67_p5 = scmp.eq.s32.totalorder %s2306_s15, 0  ;;  %s50_s20 = ssub.s32 %s2207_s13, %s2867_s17 }
  0x19   : > { %p306_p6 = scmp.eq.s32.totalorder %s2306_s15, 2  ;;  %p51_p7 = scmp.eq.s32.totalorder %s50_s20, 0 }
  0x1a   : > { %p2326_p8 = por %p67_p5, %p66_p3  ;;  %p312_p10 = scmp.eq.s32.totalorder %s1629_s16, 2 }
  0x1b   : > { %p2330_p9 = por %p306_p6, %p60_p1  ;;  %p1866_p12 = scmp.lt.s32.totalorder %s2211_s14, 3 }
  0x1c   : > { %s2833_s21 = scalar_select %p2326_p8, 1, 0 }
  0x1d   : > { %s2834_s22 = scalar_select %p2330_p9, 1, 0 }
  0x1e   : > { %s2335_s23 = scalar_select %p51_p7, %s2199_s11, %s53_s18  }
  0x1f   : > { %2835 = sst [smem:[#allocation24_spill]] %s2834_s22  ;;  %p2337_p11 = por %p312_p10, %p66_p3 }
  0x20   : > { %2836 = sst [smem:[#allocation25_spill]] %s2335_s23  ;;  %s2343_s25 = sand.u32 1, %s2199_s11  }
  0x21   : > { %s2837_s24 = scalar_select %p2337_p11, 1, 0 }
  0x22   : > { %s2346_s26 = smul.u32 12, %s2343_s25  ;;  %p2353_p13 = pnand %p1866_p12, %p2318_p4 }
  0x23   : > { %2838 = sst [smem:[#allocation26_spill]] %s2837_s24  ;;  %s2349_s27 = smul.u32 192, %s2207_s13 }
  0x24   : > { %s2813_s29 = sand.u32 1, %s2211_s14   ;;  %s2840_s1 = sld [smem:[#allocation27_spill]] }
  0x25   : > { %s357_s17 = scalar_lea.vmem [#allocation6], %s2346_s26  ;;  %s2371_s19 = scalar_lea.sflag [#allocation7], %s2813_s29 }
  0x26   : > { %s366_s23 = sshll.u32 %s357_s17, 4  ;;  %p2377_p3 = pneg %p2353_p13  ;;  %s2366_s23 = int_to_ptr.vmem [resolvable:$true] %s366_s23 }
  0x2a   : > { %s2362_s20 = scalar_lea.hbm %s2840_s1, %s2349_s27  ;;  %s1942_s24 = scalar_lea.hbm %s2840_s1, 576 }
  0x2b   : > { %s1937_s11 = scalar_lea.hbm %s2362_s20, 192  ;;  %p1943_p6 = scmp.lt.u32.totalorder %s2362_s20, %s2840_s1 }
  0x2c   : > { %p1938_p2 = scmp.ne.s32.totalorder %s2362_s20, %s1937_s11  ;;  %p1944_p7 = scmp.lt.u32.totalorder %s1942_s24, %s1937_s11 }
  0x2d   : > { %p1946_p12 = scmp.lt.u32.totalorder %s1937_s11, %s2362_s20 }
  0x2e   : > { %p1940_p4 = pnand %p2377_p3, %p1938_p2  ;;  %p1945_p10 = por %p1944_p7, %p1943_p6 }
  0x30   : > { %p1941_p5 = pneg %p1940_p4  ;;  %p1947_p0 = por %p1946_p12, %p1945_p10 }
  0x32   : > { %p1948_p1 = pnand %p1947_p0, %p1941_p5 }
  0x34   : > { %1951 = shalt.err (!%p1948_p1)
}
  0x35   : > { %s1952_s29 = scalar_lea.vmem %s2366_s23, 192  ;;  %s2213_s18 = smov [#allocation6]  }
  0x36   : > { %p1953_p2 = scmp.ne.s32.totalorder %s2366_s23, %s1952_s29  ;;  %s1957_s17 = sshll.u32 %s2213_s18, 4  ;;  %s1958_s17 = int_to_ptr.vmem [resolvable:$false] %s1957_s17 }
  0x37   : > { %s1959_s9 = scalar_lea.vmem %s1958_s17, 384  ;;  %p1960_p9 = scmp.lt.s32.totalorder %s2366_s23, %s1958_s17 }
  0x38   : > { %p1955_p4 = pnand %p1953_p2, %p2377_p3  ;;  %p1961_p8 = scmp.lt.s32.totalorder %s1959_s9, %s1952_s29 }
  0x3a   : > { %p1956_p11 = pneg %p1955_p4  ;;  %p1962_p6 = por %p1961_p8, %p1960_p9 }
  0x3c   : > { %p1963_p7 = pnand %p1962_p6, %p1956_p11 }
  0x3e   : > { %1966 = shalt.err (!%p1963_p7)
}
  0x3f   : > { %s2816_s30 = smov 64   ;;  %s2818_s11 = smov 4  }
  0x40   : > { %1849 = dma.hbm_to_vmem [thread:$0]  (!%p2353_p13), %s2362_s20, 192, %s2366_s23, %s2371_s19, %s2816_s30, %s2816_s30, %s2818_s11  }
  0x41   : > { %p2842_p8 = scmp.lt.s32.totalorder %s2211_s14, 4  ;;  %p2843_p9 = scmp.ge.s32.totalorder %s2211_s14, 1 }
  0x42   : > { %s2845_s3 = sld [smem:[#allocation28_spill]]  ;;  %s403_s9 = scalar_lea.vmem [#allocation9], %s2346_s26 }
  0x43   : > { %p2408_p11 = pnand %p2843_p9, %p2842_p8  ;;  %s412_s1 = sshll.u32 %s403_s9, 4  ;;  %s2419_s1 = int_to_ptr.vmem [resolvable:$true] %s412_s1 }
  0x44   : > { %s2846_s23 = sand.u32 1, %s2211_s14  }
  0x45   : > { %s2844_s24 = scalar_select %p2408_p11, 1, 0 }
  0x46   : > { %s2423_s20 = scalar_lea.sflag [#allocation10], %s2846_s23 }
  0x48   : > { %s2416_s17 = scalar_lea.hbm %s2845_s3, %s2349_s27  ;;  %s1972_s18 = scalar_lea.hbm %s2845_s3, 576 }
  0x49   : > { %s1967_s30 = scalar_lea.hbm %s2416_s17, 192  ;;  %p1973_p10 = scmp.lt.u32.totalorder %s2416_s17, %s2845_s3 }
  0x4a   : > { %p1968_p0 = scmp.ne.s32.totalorder %s2416_s17, %s1967_s30  ;;  %p1974_p12 = scmp.lt.u32.totalorder %s1972_s18, %s1967_s30 }
  0x4b   : > { %p1976_p4 = scmp.lt.u32.totalorder %s1967_s30, %s2416_s17 }
  0x4c   : > { %p1970_p1 = pnand %p1968_p0, %p2377_p3  ;;  %p1975_p2 = por %p1974_p12, %p1973_p10 }
  0x4e   : > { %p1971_p5 = pneg %p1970_p1  ;;  %p1977_p6 = por %p1976_p4, %p1975_p2 }
  0x50   : > { %p1978_p7 = pnand %p1977_p6, %p1971_p5 }
  0x52   : > { %1981 = shalt.err (!%p1978_p7)
}
  0x53   : > { %s1982_s9 = scalar_lea.vmem %s2419_s1, 192  ;;  %s2216_s11 = smov [#allocation9]  }
  0x54   : > { %p1983_p8 = scmp.ne.s32.totalorder %s2419_s1, %s1982_s9  ;;  %s1987_s23 = sshll.u32 %s2216_s11, 4  ;;  %s1988_s23 = int_to_ptr.vmem [resolvable:$false] %s1987_s23 }
  0x55   : > { %s1989_s8 = scalar_lea.vmem %s1988_s23, 384  ;;  %p1990_p1 = scmp.lt.s32.totalorder %s2419_s1, %s1988_s23 }
  0x56   : > { %p1985_p9 = pnand %p1983_p8, %p2377_p3  ;;  %p1991_p11 = scmp.lt.s32.totalorder %s1989_s8, %s1982_s9 }
  0x58   : > { %p1986_p0 = pneg %p1985_p9  ;;  %p1992_p10 = por %p1991_p11, %p1990_p1 }
  0x5a   : > { %p1993_p12 = pnand %p1992_p10, %p1986_p0 }
  0x5c   : > { %1996 = shalt.err (!%p1993_p12)
}
  0x5d   : > { %s2847_s22 = smov 4   ;;  %s2848_s30 = smov 64  }
  0x5e   : > { %1855 = dma.hbm_to_vmem [thread:$0]  (!%p2353_p13), %s2416_s17, 192, %s2419_s1, %s2423_s20, %s2848_s30, %s2848_s30, %s2847_s22  }
  0x5f   : > { %s2454_s9 = scalar_lea.hbm %s2798_s0, %s2349_s27  ;;  %s336_s11 = scalar_lea.vmem [#allocation3], %s2346_s26 }
  0x60   : > { %s343_s23 = sshll.u32 %s336_s11, 4  ;;  %s333_s8 = scalar_lea.sflag [#allocation4], %s2343_s25  ;;  %s2457_s23 = int_to_ptr.vmem [resolvable:$true] %s343_s23 }
  0x61   : > { %s1997_s3 = scalar_lea.hbm %s2454_s9, 192  ;;  %s2002_s29 = scalar_lea.hbm %s2798_s0, 576 }
  0x62   : > { %p1998_p11 = scmp.ne.s32.totalorder %s2454_s9, %s1997_s3  ;;  %p2003_p4 = scmp.lt.u32.totalorder %s2454_s9, %s2798_s0 }
  0x63   : > { %p2004_p6 = scmp.lt.u32.totalorder %s2002_s29, %s1997_s3  ;;  %p2006_p8 = scmp.lt.u32.totalorder %s1997_s3, %s2454_s9 }
  0x64   : > { %p2000_p5 = pnand %p1998_p11, %p2377_p3 }
  0x65   : > { %p2005_p7 = por %p2004_p6, %p2003_p4 }
  0x66   : > { %p2001_p2 = pneg %p2000_p5 }
  0x67   : > { %p2007_p9 = por %p2006_p8, %p2005_p7 }
  0x69   : > { %p2008_p0 = pnand %p2007_p9, %p2001_p2 }
  0x6b   : > { %2011 = shalt.err (!%p2008_p0)
}
  0x6c   : > { %s2012_s11 = scalar_lea.vmem %s2457_s23, 192  ;;  %s2217_s1 = smov [#allocation3]  }
  0x6d   : > { %p2013_p1 = scmp.ne.s32.totalorder %s2457_s23, %s2012_s11  ;;  %s2017_s17 = sshll.u32 %s2217_s1, 4  ;;  %s2018_s17 = int_to_ptr.vmem [resolvable:$false] %s2017_s17 }
  0x6e   : > { %s2019_s14 = scalar_lea.vmem %s2018_s17, 384  ;;  %p2020_p11 = scmp.lt.s32.totalorder %s2457_s23, %s2018_s17 }
  0x6f   : > { %p2015_p10 = pnand %p2013_p1, %p2377_p3  ;;  %p2021_p5 = scmp.lt.s32.totalorder %s2019_s14, %s2012_s11 }
  0x71   : > { %p2016_p12 = pneg %p2015_p10  ;;  %p2022_p4 = por %p2021_p5, %p2020_p11 }
  0x73   : > { %p2023_p6 = pnand %p2022_p4, %p2016_p12 }
  0x75   : > { %2026 = shalt.err (!%p2023_p6)
}
  0x76   : > { %1846 = dma.hbm_to_vmem [thread:$0]  (!%p2353_p13), %s2454_s9, 192, %s2457_s23, %s333_s8, %s2848_s30, %s2848_s30, %s2847_s22  }
  0x77   : > { %s2490_s18 = scalar_lea.hbm %s2800_s2, %s2349_s27  ;;  %s380_s11 = scalar_lea.vmem [#allocation8], %s2346_s26 }
  0x78   : > { %s389_s1 = sshll.u32 %s380_s11, 4  ;;  %s2027_s17 = scalar_lea.hbm %s2490_s18, 192  ;;  %s2493_s1 = int_to_ptr.vmem [resolvable:$true] %s389_s1 }
  0x79   : > { %p2028_p2 = scmp.ne.s32.totalorder %s2490_s18, %s2027_s17  ;;  %s2032_s23 = scalar_lea.hbm %s2800_s2, 576 }
  0x7a   : > { %p2033_p9 = scmp.lt.u32.totalorder %s2490_s18, %s2800_s2  ;;  %p2034_p0 = scmp.lt.u32.totalorder %s2032_s23, %s2027_s17 }
  0x7b   : > { %p2030_p7 = pnand %p2028_p2, %p2377_p3  ;;  %p2036_p10 = scmp.lt.u32.totalorder %s2027_s17, %s2490_s18 }
  0x7c   : > { %p2035_p1 = por %p2034_p0, %p2033_p9 }
  0x7d   : > { %p2031_p8 = pneg %p2030_p7 }
  0x7e   : > { %p2037_p12 = por %p2036_p10, %p2035_p1 }
  0x80   : > { %p2038_p11 = pnand %p2037_p12, %p2031_p8 }
  0x82   : > { %2041 = shalt.err (!%p2038_p11)
}
  0x83   : > { %s2042_s29 = scalar_lea.vmem %s2493_s1, 192  ;;  %s2218_s11 = smov [#allocation8]  }
  0x84   : > { %p2043_p5 = scmp.ne.s32.totalorder %s2493_s1, %s2042_s29  ;;  %s2047_s14 = sshll.u32 %s2218_s11, 4  ;;  %s2048_s14 = int_to_ptr.vmem [resolvable:$false] %s2047_s14 }
  0x85   : > { %s2049_s9 = scalar_lea.vmem %s2048_s14, 384  ;;  %p2050_p2 = scmp.lt.s32.totalorder %s2493_s1, %s2048_s14 }
  0x86   : > { %p2045_p4 = pnand %p2043_p5, %p2377_p3  ;;  %p2051_p7 = scmp.lt.s32.totalorder %s2049_s9, %s2042_s29 }
  0x88   : > { %p2046_p6 = pneg %p2045_p4  ;;  %p2052_p9 = por %p2051_p7, %p2050_p2 }
  0x8a   : > { %p2053_p0 = pnand %p2052_p9, %p2046_p6 }
  0x8c   : > { %2056 = shalt.err (!%p2053_p0)
}
  0x8d   : > { %1852 = dma.hbm_to_vmem [thread:$0]  (!%p2353_p13), %s2490_s18, 192, %s2493_s1, %s2371_s19, %s2848_s30, %s2848_s30, %s2847_s22  }
  0x8e   : > { %s2524_s8 = scalar_lea.hbm %s2802_s4, %s2349_s27  ;;  %s426_s3 = scalar_lea.vmem [#allocation11], %s2346_s26 }
  0x8f   : > { %s433_s29 = sshll.u32 %s426_s3, 4  ;;  %s2057_s11 = scalar_lea.hbm %s2524_s8, 192  ;;  %s2527_s29 = int_to_ptr.vmem [resolvable:$true] %s433_s29 }
  0x90   : > { %p2058_p8 = scmp.ne.s32.totalorder %s2524_s8, %s2057_s11  ;;  %s2062_s18 = scalar_lea.hbm %s2802_s4, 576 }
  0x91   : > { %p2063_p12 = scmp.lt.u32.totalorder %s2524_s8, %s2802_s4  ;;  %p2064_p11 = scmp.lt.u32.totalorder %s2062_s18, %s2057_s11 }
  0x92   : > { %p2060_p1 = pnand %p2058_p8, %p2377_p3  ;;  %p2066_p4 = scmp.lt.u32.totalorder %s2057_s11, %s2524_s8 }
  0x93   : > { %p2065_p5 = por %p2064_p11, %p2063_p12 }
  0x94   : > { %p2061_p10 = pneg %p2060_p1 }
  0x95   : > { %p2067_p6 = por %p2066_p4, %p2065_p5 }
  0x97   : > { %p2068_p2 = pnand %p2067_p6, %p2061_p10 }
  0x99   : > { %2071 = shalt.err (!%p2068_p2)
}
  0x9a   : > { %s2072_s26 = scalar_lea.vmem %s2527_s29, 192  ;;  %s2219_s9 = smov [#allocation11]  }
  0x9b   : > { %p2073_p7 = scmp.ne.s32.totalorder %s2527_s29, %s2072_s26  ;;  %s2077_s17 = sshll.u32 %s2219_s9, 4  ;;  %s2078_s17 = int_to_ptr.vmem [resolvable:$false] %s2077_s17 }
  0x9c   : > { %s2079_s23 = scalar_lea.vmem %s2078_s17, 384  ;;  %p2080_p8 = scmp.lt.s32.totalorder %s2527_s29, %s2078_s17 }
  0x9d   : > { %p2075_p9 = pnand %p2073_p7, %p2377_p3  ;;  %p2081_p1 = scmp.lt.s32.totalorder %s2079_s23, %s2072_s26 }
  0x9f   : > { %p2076_p0 = pneg %p2075_p9  ;;  %p2082_p12 = por %p2081_p1, %p2080_p8 }
  0xa1   : > { %p2083_p11 = pnand %p2082_p12, %p2076_p0 }
  0xa3   : > { %2086 = shalt.err (!%p2083_p11)
}
  0xa4   : > { %1858 = dma.hbm_to_vmem [thread:$0]  (!%p2353_p13), %s2524_s8, 192, %s2527_s29, %s2423_s20, %s2848_s30, %s2848_s30, %s2847_s22  }
  0xa5   : > { %s1637_s3 = sshll.u32 %s2343_s25, 6  ;;  %s1707_s11 = sshll.u32 %s2207_s13, 10 }
  0xa6   : > { %s2559_s18 = scalar_lea.hbm %s2804_s6, %s1707_s11  ;;  %s457_s1 = scalar_lea.vmem [#allocation12], %s1637_s3 }
  0xa7   : > { %s465_s27 = sshll.u32 %s457_s1, 4  ;;  %s454_s26 = scalar_lea.sflag [#allocation13], %s2343_s25  ;;  %s2561_s27 = int_to_ptr.vmem [resolvable:$true] %s465_s27 }
  0xa8   : > { %s2087_s9 = scalar_lea.hbm %s2559_s18, 1024  ;;  %s2092_s29 = scalar_lea.hbm %s2804_s6, 3072 }
  0xa9   : > { %p2088_p10 = scmp.ne.s32.totalorder %s2559_s18, %s2087_s9  ;;  %p2093_p6 = scmp.lt.u32.totalorder %s2559_s18, %s2804_s6 }
  0xaa   : > { %p2094_p2 = scmp.lt.u32.totalorder %s2092_s29, %s2087_s9  ;;  %p2096_p9 = scmp.lt.u32.totalorder %s2087_s9, %s2559_s18 }
  0xab   : > { %p2090_p5 = pnand %p2088_p10, %p2377_p3 }
  0xac   : > { %p2095_p7 = por %p2094_p2, %p2093_p6 }
  0xad   : > { %p2091_p4 = pneg %p2090_p5 }
  0xae   : > { %p2097_p0 = por %p2096_p9, %p2095_p7 }
  0xb0   : > { %p2098_p8 = pnand %p2097_p0, %p2091_p4 }
  0xb2   : > { %2101 = shalt.err (!%p2098_p8)
}
  0xb3   : > { %s2102_s3 = scalar_lea.vmem %s2561_s27, 1024  ;;  %s2220_s11 = smov [#allocation12]  }
  0xb4   : > { %p2103_p1 = scmp.ne.s32.totalorder %s2561_s27, %s2102_s3  ;;  %s2107_s14 = sshll.u32 %s2220_s11, 4  ;;  %s2108_s14 = int_to_ptr.vmem [resolvable:$false] %s2107_s14 }
  0xb5   : > { %s2109_s19 = scalar_lea.vmem %s2108_s14, 2048  ;;  %p2110_p10 = scmp.lt.s32.totalorder %s2561_s27, %s2108_s14 }
  0xb6   : > { %p2105_p12 = pnand %p2103_p1, %p2377_p3  ;;  %p2111_p5 = scmp.lt.s32.totalorder %s2109_s19, %s2102_s3 }
  0xb8   : > { %p2106_p11 = pneg %p2105_p12  ;;  %p2112_p6 = por %p2111_p5, %p2110_p10 }
  0xba   : > { %p2113_p2 = pnand %p2112_p6, %p2106_p11 }
  0xbc   : > { %2116 = shalt.err (!%p2113_p2)
}
  0xbd   : > { %1861 = dma.hbm_to_vmem [thread:$0]  (!%p2353_p13), %s2559_s18, 1024, %s2561_s27, %s454_s26, %s2848_s30, %s2848_s30, %s2847_s22  }
  0xbe   : > { %p2849_p3 = scmp.ne.s32.totalorder %s2844_s24, 0 }
  0xbf   : > { %s2593_s16 = sand.u32 (!%p2849_p3), 1, %s2195_s10   ;;  %p2850_p4 = scmp.ne.s32.totalorder (!%p2849_p3), %s2833_s21, 0 }
  0xc0   : > { %492 = sbr.rel (%p2849_p3) target bundleno = 1384 (0x568), region = 56  ;;  %s495_s28 = scalar_lea.sflag (!%p2849_p3), [#allocation4], %s2593_s16 }
  0xc1   : > { %s2596_s1 = smul.u32 (!%p2849_p3), 12, %s2593_s16 }
  0xc3   : > { %s498_s9 = scalar_lea.vmem (!%p2849_p3), [#allocation3], %s2596_s1 }
  0xc7   : > { %2170 = dma.done.wait (%p2850_p4), %s495_s28, 192  }
  0xc8   : > { %2172 = vsyncadd (%p2850_p4), %s495_s28, 4294967104  ;;  %s503_s25 = sand.u32 1, %s2306_s15   ;;  %s507_s22 = scalar_lea.vmem [#allocation6], %s2596_s1 }
  0xc9   : > { %s504_s24 = scalar_lea.sflag [#allocation7], %s503_s25 }
  0xca   : > { %2174 = dma.done.wait (%p2850_p4), %s504_s24, 384  }
  0xcb   : > { %2176 = vsyncadd (%p2850_p4), %s504_s24, 4294966912  ;;  %s2611_s30 = scalar_lea.vmem [#allocation8], %s2596_s1  ;;  %s522_s18 = scalar_lea.sflag [#allocation10], %s503_s25 }
  0xcc   : > { %s525_s27 = scalar_lea.vmem [#allocation9], %s2596_s1 }
  0xcd   : > { %2178 = dma.done.wait (%p2850_p4), %s522_s18, 384  }
  0xce   : > { %2180 = vsyncadd (%p2850_p4), %s522_s18, 4294966912  ;;  %s1642_s15 = sshll.u32 %s2593_s16, 6  ;;  %s534_s26 = scalar_lea.vmem [#allocation11], %s2596_s1 }
  0xcf   : > { %s540_s20 = scalar_lea.sflag [#allocation13], %s2593_s16  ;;  %s2621_s8 = scalar_lea.vmem [#allocation12], %s1642_s15 }
  0xd0   : > { %2182 = dma.done.wait (%p2850_p4), %s540_s20, 1024  }
  0xd1   : > { %2184 = vsyncadd (%p2850_p4), %s540_s20, 4294966272  ;;  %s1827_s29 = smul.u32 24, %s2593_s16  ;;  %s1643_s17 = sshll.u32 %s2203_s12, 1  ;;  %v640_v0 = vld [vmem:[%s498_s9] sm:$0xf]  ;;  %v2641_v3 = vld [vmem:[%s507_s22] sm:$0xff]  }
  0xd2   : > { %p622_p13 = scmp.lt.s32.totalorder %s1643_s17, 5  ;;  %p629_p7 = scmp.lt.s32.totalorder %s2203_s12, 2  ;;  %v641_v1 = vld [vmem:[%s498_s9 + $0x4] sm:$0xf]  ;;  %v642_v2 = vld [vmem:[%s498_s9 + $0x8] sm:$0xf]  ;;  %v1712_v6 = vunpack.c.l.bf16 %v2641_v3  ;;  %v1713_v7 = vunpack.c.h.bf16 %v2641_v3 }
  0xd3   : > { %v2643_v4 = vld [vmem:[%s507_s22 + $0x8] sm:$0xf]  ;;  %v649_v5 = vld [vmem:[%s2611_s30] sm:$0xf]  ;;  %v650_v9 = vld [vmem:[%s2611_s30 + $0x4] sm:$0xf] }
  0xd4   : > { %s2869_s17 = smov (!%p622_p13, %s1643_s17), 5  ;;  %v648_v8 = vunpack.c.l.bf16 %v2643_v4  ;;  %v651_v10 = vld [vmem:[%s2611_s30 + $0x8] sm:$0xf]  ;;  %s2851_s20 = sld [smem:[#allocation29_spill]] }
  0xd5   : > { %s630_s23 = scalar_select %p629_p7, %s2203_s12, 2 }
  0xd6   : > { %s1708_s3 = sshll.u32 %s2869_s17, 4  ;;  %p1649_p9 = scmp.ne.s32.totalorder %s2203_s12, 0 }
  0xd7   : > { %s2634_s19 = scalar_lea.vmem %s2803_s5, %s1708_s3  ;;  %s1709_s21 = sshll.u32 %s630_s23, 4  ;;  %vm656_vm0 = vcmask (!%p1649_p9), 261120   ;;  %v2221_v11 = vmov (!%p1649_p9), 0.0  }
  0xd8   : > { %s2639_s24 = scalar_lea.vmem %s2805_s7, %s1709_s21  ;;  %s1648_s18 = sshll.u32 %s630_s23, 1  ;;  %657 = vst.msk [vmem:[#allocation2] sm:$0xff] (!%p1649_p9), %vm656_vm0, %v2221_v11  ;;  %658 = vst.msk [vmem:[#allocation2 + $0x8] sm:$0xff] (!%p1649_p9), %vm656_vm0, %v2221_v11 }
  0xd9   : > { %s2656_s3 = scalar_lea.vmem [#allocation14], %s1827_s29  ;;  %655 = sbr.rel (%p1649_p9) target bundleno = 224 (0xe0), region = 84  ;;  %659 = vst.msk [vmem:[#allocation2 + $0x10] sm:$0xff] (!%p1649_p9), %vm656_vm0, %v2221_v11 }
  0xda   : > { %s2654_s17 = scalar_lea.vmem %s2851_s20, %s1648_s18 }
  0xe0 PF: > { %p1650_p0 = scmp.le.s32.totalorder %s2203_s12, 0 }
  0xe1   : > { %v1921_v12 = vld [vmem:[%s534_s26] sm:$0xff] (!%p1650_p0)   ;;  %vm694_vm1 = vcmask (!%p1650_p0), 1043456   ;;  %v1922_v13 = vld [vmem:[%s534_s26 + $0x8] ss:$0 sps:$4 sm:$0xff] (!%p1650_p0)   ;;  %vm687_vm2 = vcmask (!%p1650_p0), 195584   ;;  %vm746_vm3 = vcmask (!%p1650_p0), 261120  }
  0xe2   : > { %663 = sbr.rel (%p1650_p0) target bundleno = 450 (0x1c2), region = 88  ;;  %1746 = vmatprep.subr.bf16.mxu0 (!%p1650_p0), %v1921_v12  ;;  %v1923_v14 = vld [vmem:[%s525_s27] sm:$0xff] (!%p1650_p0)   ;;  %v696_v15 = vsel (!%p1650_p0), %vm694_vm1, %v1922_v13, 0  ;;  %v1924_v16 = vld [vmem:[%s525_s27 + $0x8] ss:$0 sps:$4 sm:$0xff] (!%p1650_p0)  }
  0xe3   : > { %1747 = vmatpush3.bf16.msra.mxu0 (!%p1650_p0), %v1921_v12  ;;  %1750 = vmatprep.mubr.msk.bf16.mxu0 (!%p1650_p0), %vm687_vm2, %v1923_v14 }
  0xe4   : > { %1814 = vmatprep.subr.msk.bf16.mxu0 (!%p1650_p0), %vm694_vm1, %v1922_v13 }
  0xe7   : > { %1749 = vmatpush3.bf16.msra.mxu0 (!%p1650_p0), %v696_v15 }
  0xea   : > { %1751 = vmatmul.mubr.msk.bf16.vlgmr.msra.gmra.mrb[0].mxu0 %vm687_vm2, %v1924_v16 }
 0x1bd   : > { %v1752_v17 = vpop.f32.mrb[0].mxu0 }
 0x1be   : > { %749 = vst.msk [vmem:[#allocation2 + $0x10] sm:$0xff] %vm746_vm3, %v1752_v17  ;;  %v732_v18 = vpop.f32.mrb[1].mxu0 }
 0x1bf   : > { %747 = vst.msk [vmem:[#allocation2] sm:$0xff] %vm746_vm3, %v732_v18  ;;  %v1753_v19 = vpop.f32.mrb[2].mxu0 }
 0x1c0   : > { %v735_v20 = vpop.f32.mrb[3].mxu0 }
 0x1c1   : > { %748 = vst.msk [vmem:[#allocation2 + $0x8] sm:$0xff] %vm746_vm3, %v735_v20 }
 0x1c2 PF: > { %v1659_v21 = vcombine.low %v640_v0, %v641_v1  ;;  %v1660_v22 = vcombine.low %v642_v2, %v642_v2  ;;  %vm782_vm4 = vcmask 1043456   ;;  %v1657_v23 = vcombine.low %v649_v5, %v650_v9  ;;  %v1925_v26 = vld [vmem:[%s2634_s19] sm:$0xff]   ;;  %v1926_v27 = vld [vmem:[%s2634_s19 + $0x8] sm:$0xff]   ;;  %v1927_v28 = vld [vmem:[%s2634_s19 + $0x10] sm:$0xff]   ;;  %s1828_s1 = smul.u32 384, %s2203_s12  ;;  %s2852_s22 = sld [smem:[#allocation24_spill]] }
 0x1c3   : > { %vm775_vm5 = vcmask 195584   ;;  %v1658_v25 = vcombine.low %v651_v10, %v651_v10  ;;  %1762 = vmatprep.subr.bf16.mxu1 %v1925_v26  ;;  %v751_v29 = vlaneseq  ;;  %v750_v33 = vld [vmem:[%s2654_s17] sm:$0x3]  ;;  %vm871_vm6 = vcmask 261120   ;;  %v1928_v57 = vld [vmem:[%s2634_s19 + $0x18] sm:$0xff]   ;;  %v1929_v60 = vld [vmem:[%s2621_s8] sm:$0xff]  }
 0x1c4   : > { %1754 = vmatprep.subr.bf16.mxu0 %v1659_v21  ;;  %1758 = vmatprep.mubr.msk.bf16.mxu0 %vm775_vm5, %v1657_v23  ;;  %v784_v24 = vsel %vm782_vm4, %v1660_v22, 0  ;;  %v1930_v61 = vld [vmem:[%s2621_s8 + $0x8] sm:$0xff]   ;;  %v1931_v62 = vld [vmem:[%s2621_s8 + $0x10] sm:$0xff]   ;;  %s1390_s30 = sshll.u32 %s2656_s3, 4  ;;  %s1375_s12 = scalar_lea.sflag [#allocation5], %s2593_s16  ;;  %s2746_s30 = int_to_ptr.vmem [resolvable:$true] %s1390_s30 }
 0x1c5   : > { %1755 = vmatpush3.bf16.msra.mxu0 %v1659_v21  ;;  %1763 = vmatpush3.bf16.msra.mxu1 %v1925_v26  ;;  %v2671_v30 = vshrl.u32 %v751_v29, 7  ;;  %v836_v55 = vld [vmem:[#allocation2 + $0x10] sm:$0xff]  ;;  %v2703_v63 = vld [vmem:[%s2639_s24] sm:$0xff]  ;;  %s2117_s23 = scalar_lea.vmem %s2746_s30, 384  ;;  %s2222_s11 = smov [#allocation14]  }
 0x1c6   : > { %1815 = vmatprep.subr.msk.bf16.mxu0 %vm782_vm4, %v1660_v22  ;;  %1764 = vmatprep.subr.bf16.mxu1 %v1926_v27  ;;  %v834_v39 = vld [vmem:[#allocation2] sm:$0xff]  ;;  %p2118_p8 = scmp.ne.s32.totalorder %s2746_s30, %s2117_s23  ;;  %s2121_s14 = sshll.u32 %s2222_s11, 4  ;;  %s2122_s14 = int_to_ptr.vmem [resolvable:$false] %s2121_s14 }
 0x1c7   : > { %v2674_v31 = vsub.s32 1, %v2671_v30  ;;  %v2677_v32 = vsub.s32 0, %v2671_v30  ;;  %v1108_v5 = vsub.s32 4, %v2671_v30  ;;  %v1115_v10 = vsub.s32 5, %v2671_v30  ;;  %s2123_s19 = scalar_lea.vmem %s2122_s14, 768  ;;  %p2124_p10 = scmp.lt.s32.totalorder %s2746_s30, %s2122_s14 }
 0x1c8   : > { %v835_v40 = vld [vmem:[#allocation2 + $0x8] sm:$0xff]  ;;  %p2854_p1 = scmp.ne.s32.totalorder %s2852_s22, 0  ;;  %p2125_p5 = scmp.lt.s32.totalorder %s2123_s19, %s2117_s23 }
 0x1c9   : > { %1757 = vmatpush3.bf16.msra.mxu0 %v784_v24  ;;  %1765 = vmatpush3.bf16.msra.mxu1 %v1926_v27  ;;  %v840_v34 = vrot.slane %v750_v33, %v2674_v31  ;;  %v754_v35 = vrot.slane %v750_v33, %v2677_v32  ;;  %v929_v0 = vrot.slane %v2703_v63, %v2677_v32 }
 0x1ca   : > { %1778 = vmatprep.subr.bf16.mxu1 %v1927_v28  ;;  %1770 = vmatprep.subr.bf16.mxu0 %v1929_v60  ;;  %v936_v1 = vrot.slane %v2703_v63, %v2674_v31  ;;  %v1109_v13 = vrot.slane %v2703_v63, %v1108_v5  ;;  %v1116_v16 = vrot.slane %v2703_v63, %v1115_v10  ;;  %p2119_p12 = pnand %p2118_p8, %p2854_p1  ;;  %p2126_p6 = por %p2125_p5, %p2124_p10 }
 0x1cb   : > { %v841_v36 = vmul.f32 %v1712_v6, %v840_v34  ;;  %v842_v37 = vmul.f32 %v1713_v7, %v840_v34  ;;  %v757_v38 = vmul.f32 %v754_v35, %v648_v8  ;;  %v755_v42 = vmul.f32 %v1712_v6, %v754_v35 }
 0x1cc   : > { %1759 = vmatmul.mubr.msk.bf16.vlgmr.msra.gmra.mrb[0].mxu0 %vm775_vm5, %v1658_v25  ;;  %v756_v43 = vmul.f32 %v1713_v7, %v754_v35  ;;  %v843_v52 = vmul.f32 %v840_v34, %v648_v8  ;;  %p2120_p11 = pneg %p2119_p12 }
 0x1cd   : > { %v844_v46 = vadd.f32 %v841_v36, %v834_v39  ;;  %v845_v47 = vadd.f32 %v842_v37, %v835_v40  ;;  %1771 = vmatpush3.bf16.msra.mxu0 %v1929_v60  ;;  %v1933_v40 = vld [vmem:[%s2621_s8 + $0x30] sm:$0xff]  }
 0x1ce   : > { %v846_v58 = vadd.f32 %v843_v52, %v836_v55  ;;  %1772 = vmatprep.subr.bf16.mxu0 %v1930_v61  ;;  %p2127_p2 = pnand %p2126_p6, %p2120_p11 }
 0x1cf   : > { %v1038_v54 = vpack.c.bf16 %v845_v47, %v844_v46 }
 0x1d0   : > { %v1039_v59 = vpack.c.bf16 %v846_v58, %v846_v58 }
 0x1d1   : > { %1773 = vmatpush3.bf16.msra.mxu0 %v1930_v61 }
 0x1d2   : > { %1786 = vmatprep.subr.bf16.mxu0 %v1931_v62 }
 0x29f   : > { %v1760_v41 = vpop.f32.mrb[0].mxu0 }
 0x2a0   : > { %v820_v44 = vpop.f32.mrb[1].mxu0  ;;  %v829_v48 = vadd.f32 %v1760_v41, %v757_v38  ;;  %v1934_v41 = vld [vmem:[%s2621_s8 + $0x38] sm:$0xff]  }
 0x2a1   : > { %v1761_v45 = vpop.f32.mrb[2].mxu0  ;;  %v821_v50 = vadd.f32 %v820_v44, %v755_v42  ;;  %v1935_v42 = vld [vmem:[%s2621_s8 + $0x20] sm:$0xff]   ;;  %v1020_v44 = vsub.s32 3, %v2671_v30 }
 0x2a2   : > { %v823_v49 = vpop.f32.mrb[3].mxu0  ;;  %v858_v56 = vpack.c.bf16 %v829_v48, %v829_v48 }
 0x2a3   : > { %v824_v51 = vadd.f32 %v823_v49, %v756_v43  ;;  %v1013_v43 = vsub.s32 2, %v2671_v30  ;;  %v1021_v47 = vrot.slane %v2703_v63, %v1020_v44  ;;  %v1193_v49 = vsub.s32 6, %v2671_v30 }
 0x2a5   : > { %v857_v53 = vpack.c.bf16 %v824_v51, %v821_v50  ;;  %v1014_v45 = vrot.slane %v2703_v63, %v1013_v43 }
 0x2a7   : > { %1766 = vmatprep.mubr.msk.bf16.mxu1 %vm871_vm6, %v857_v53  ;;  %v1200_v53 = vsub.s32 7, %v2671_v30 }
 0x2a8   : > { %1767 = vmatmul.mubr.msk.bf16.vlgmr.msra.gmra.mrb[0].mxu1 %vm871_vm6, %v858_v56  ;;  %v1194_v56 = vrot.slane %v2703_v63, %v1193_v49 }
 0x2a9   : > { %1779 = vmatpush3.bf16.msra.mxu1 %v1927_v28  ;;  %1782 = vmatprep.mubr.msk.bf16.mxu1 %vm871_vm6, %v1038_v54  ;;  %v1932_v28 = vld [vmem:[%s2621_s8 + $0x18] sm:$0xff]   ;;  %v1201_v58 = vrot.slane %v2703_v63, %v1200_v53 }
 0x2aa   : > { %1780 = vmatprep.subr.bf16.mxu1 %v1928_v57 }
 0x2ad   : > { %1781 = vmatpush3.bf16.msra.mxu1 %v1928_v57 }
 0x2ae   : > { %1794 = vmatprep.subr.bf16.mxu1 %v1933_v40 }
 0x2b0   : > { %1783 = vmatmul.mubr.msk.bf16.vlgmr.msra.gmra.mrb[4].mxu1 %vm871_vm6, %v1039_v59 }
 0x2b1   : > { %1795 = vmatpush3.bf16.msra.mxu1 %v1933_v40 }
 0x2b2   : > { %1796 = vmatprep.subr.bf16.mxu1 %v1934_v41 }
 0x2b5   : > { %1797 = vmatpush3.bf16.msra.mxu1 %v1934_v41 }
 0x2b6   : > { %1802 = vmatprep.subr.bf16.mxu1 %v1935_v42 }
 0x37b   : > { %v1768_v2 = vpop.f32.mrb[0].mxu1 }
 0x37c   : > { %v932_v3 = vmul.f32 %v1768_v2, %v929_v0  ;;  %v912_v4 = vpop.f32.mrb[1].mxu1 }
 0x37d   : > { %v930_v6 = vmul.f32 %v929_v0, %v912_v4  ;;  %v1769_v7 = vpop.f32.mrb[2].mxu1 }
 0x37e   : > { %v939_v8 = vadd.f32 %v936_v1, %v932_v3  ;;  %v915_v9 = vpop.f32.mrb[3].mxu1 }
 0x37f   : > { %v937_v11 = vadd.f32 %v936_v1, %v930_v6  ;;  %v931_v12 = vmul.f32 %v929_v0, %v915_v9 }
 0x380   : > { %v942_v15 = vmax.f32 %v939_v8, 0.0 }
 0x381   : > { %v938_v14 = vadd.f32 %v936_v1, %v931_v12  ;;  %v940_v17 = vmax.f32 %v937_v11, 0.0 }
 0x382   : > { %v944_v25 = vpack.c.bf16 %v942_v15, %v942_v15 }
 0x383   : > { %v941_v18 = vmax.f32 %v938_v14, 0.0  ;;  %v1784_v19 = vpop.f32.mrb[4].mxu1 }
 0x384   : > { %v1112_v20 = vmul.f32 %v1784_v19, %v1109_v13  ;;  %v1092_v21 = vpop.f32.mrb[5].mxu1 }
 0x385   : > { %v943_v22 = vpack.c.bf16 %v941_v18, %v940_v17  ;;  %v1110_v23 = vmul.f32 %v1109_v13, %v1092_v21  ;;  %v1785_v24 = vpop.f32.mrb[6].mxu1  ;;  %v848_v17 = vld [vmem:[%s2639_s24 + $0x8] sm:$0x3] }
 0x386   : > { %v1119_v26 = vadd.f32 %v1116_v16, %v1112_v20  ;;  %v1095_v27 = vpop.f32.mrb[7].mxu1  ;;  %v1357_v18 = vrot.slane %v848_v17, %v2677_v32  ;;  %v1364_v19 = vrot.slane %v848_v17, %v2674_v31 }
 0x387   : > { %v1117_v29 = vadd.f32 %v1116_v16, %v1110_v23  ;;  %v1111_v33 = vmul.f32 %v1109_v13, %v1095_v27  ;;  %1774 = vmatprep.mubr.msk.bf16.mxu0 %vm871_vm6, %v943_v22  ;;  %v1936_v13 = vld [vmem:[%s2621_s8 + $0x28] sm:$0xff]   ;;  %s2853_s8 = sld [smem:[#allocation30_spill]] }
 0x388   : > { %1775 = vmatmul.mubr.msk.bf16.vlgmr.msra.gmra.mrb[4].mxu0 %vm871_vm6, %v944_v25  ;;  %v1122_v35 = vmax.f32 %v1119_v26, 0.0 }
 0x389   : > { %v1118_v34 = vadd.f32 %v1116_v16, %v1111_v33  ;;  %1787 = vmatpush3.bf16.msra.mxu0 %v1931_v62  ;;  %v1120_v36 = vmax.f32 %v1117_v29, 0.0 }
 0x38a   : > { %1788 = vmatprep.subr.bf16.mxu0 %v1932_v28  ;;  %v1124_v39 = vpack.c.bf16 %v1122_v35, %v1122_v35 }
 0x38b   : > { %v1121_v37 = vmax.f32 %v1118_v34, 0.0 }
 0x38d   : > { %v1123_v38 = vpack.c.bf16 %v1121_v37, %v1120_v36  ;;  %1789 = vmatpush3.bf16.msra.mxu0 %v1932_v28  ;;  %s2744_s29 = scalar_lea.hbm %s2853_s8, %s1828_s1 }
 0x38f   : > { %1790 = vmatprep.mubr.msk.bf16.mxu0 %vm871_vm6, %v1123_v38 }
 0x390   : > { %1791 = vmatmul.mubr.msk.bf16.vlgmr.msra.gmra.mrb[8].mxu0 %vm871_vm6, %v1124_v39 }
 0x45b   : > { %v1776_v46 = vpop.f32.mrb[4].mxu0 }
 0x45c   : > { %v997_v48 = vpop.f32.mrb[5].mxu0  ;;  %v1017_v63 = vmul.f32 %v1776_v46, %v1014_v45 }
 0x45d   : > { %v1015_v50 = vmul.f32 %v1014_v45, %v997_v48  ;;  %v1777_v51 = vpop.f32.mrb[6].mxu0 }
 0x45e   : > { %v1000_v52 = vpop.f32.mrb[7].mxu0  ;;  %v1024_v14 = vadd.f32 %v1021_v47, %v1017_v63 }
 0x45f   : > { %v1022_v54 = vadd.f32 %v1021_v47, %v1015_v50  ;;  %v1016_v55 = vmul.f32 %v1014_v45, %v1000_v52 }
 0x460   : > { %v1027_v15 = vmax.f32 %v1024_v14, 0.0 }
 0x461   : > { %v1023_v57 = vadd.f32 %v1021_v47, %v1016_v55  ;;  %v1025_v59 = vmax.f32 %v1022_v54, 0.0 }
 0x462   : > { %v1209_v16 = vpack.c.bf16 %v1027_v15, %v1027_v15 }
 0x463   : > { %v1026_v60 = vmax.f32 %v1023_v57, 0.0  ;;  %v1792_v61 = vpop.f32.mrb[8].mxu0 }
 0x464   : > { %v1197_v62 = vmul.f32 %v1792_v61, %v1194_v56  ;;  %v1177_v0 = vpop.f32.mrb[9].mxu0 }
 0x465   : > { %v1208_v1 = vpack.c.bf16 %v1026_v60, %v1025_v59  ;;  %v1195_v2 = vmul.f32 %v1194_v56, %v1177_v0  ;;  %v1793_v3 = vpop.f32.mrb[10].mxu0 }
 0x466   : > { %v1204_v4 = vadd.f32 %v1201_v58, %v1197_v62  ;;  %v1180_v5 = vpop.f32.mrb[11].mxu0 }
 0x467   : > { %v1202_v6 = vadd.f32 %v1201_v58, %v1195_v2  ;;  %v1196_v30 = vmul.f32 %v1194_v56, %v1180_v5 }
 0x468   : > { %v1207_v8 = vmax.f32 %v1204_v4, 0.0 }
 0x469   : > { %v1203_v7 = vadd.f32 %v1201_v58, %v1196_v30  ;;  %v1205_v9 = vmax.f32 %v1202_v6, 0.0 }
 0x46a   : > { %v1216_v12 = vpack.c.bf16 %v1207_v8, %v1207_v8 }
 0x46b   : > { %v1206_v10 = vmax.f32 %v1203_v7, 0.0 }
 0x46d   : > { %v1215_v11 = vpack.c.bf16 %v1206_v10, %v1205_v9 }
 0x46f   : > { %1798 = vmatprep.mubr.msk.bf16.mxu1 %vm871_vm6, %v1215_v11 }
 0x470   : > { %1799 = vmatmul.mubr.msk.bf16.vlgmr.msra.gmra.mrb[8].mxu1 %vm871_vm6, %v1216_v12 }
 0x471   : > { %1803 = vmatpush3.bf16.msra.mxu1 %v1935_v42  ;;  %1806 = vmatprep.mubr.msk.bf16.mxu1 %vm871_vm6, %v1208_v1 }
 0x472   : > { %1804 = vmatprep.subr.bf16.mxu1 %v1936_v13 }
 0x475   : > { %1805 = vmatpush3.bf16.msra.mxu1 %v1936_v13 }
 0x47c   : > { %1807 = vmatmul.mubr.msk.bf16.vlgmr.msra.gmra.mrb[8].mxu1 %vm871_vm6, %v1209_v16 }
 0x54f   : > { %v1808_v20 = vpop.f32.mrb[8].mxu1 }
 0x550   : > { %v1360_v21 = vmul.f32 %v1808_v20, %v1357_v18  ;;  %v1340_v22 = vpop.f32.mrb[9].mxu1 }
 0x551   : > { %v1358_v23 = vmul.f32 %v1357_v18, %v1340_v22  ;;  %v1809_v24 = vpop.f32.mrb[10].mxu1 }
 0x552   : > { %v1367_v25 = vadd.f32 %v1364_v19, %v1360_v21  ;;  %v1343_v26 = vpop.f32.mrb[11].mxu1 }
 0x553   : > { %v1365_v27 = vadd.f32 %v1364_v19, %v1358_v23  ;;  %v1359_v28 = vmul.f32 %v1357_v18, %v1343_v26 }
 0x554   : > { %v1370_v29 = vmax.f32 %v1367_v25, 0.0 }
 0x555   : > { %v1368_v32 = vmax.f32 %v1365_v27, 0.0  ;;  %v1366_v33 = vadd.f32 %v1364_v19, %v1359_v28 }
 0x556   : > { %1373 = vst.msk [vmem:[%s2656_s3 + $0x10] sm:$0xff] %vm871_vm6, %v1370_v29 }
 0x557   : > { %1371 = vst.msk [vmem:[%s2656_s3] sm:$0xff] %vm871_vm6, %v1368_v32  ;;  %v1369_v31 = vmax.f32 %v1366_v33, 0.0 }
 0x559   : > { %1372 = vst.msk [vmem:[%s2656_s3 + $0x8] sm:$0xff] %vm871_vm6, %v1369_v31 }
 0x55a   : > { %2130 = shalt.err (!%p2127_p2)
}
 0x55b   : > { %s2131_s21 = scalar_lea.hbm %s2744_s29, 384  ;;  %s2135_s24 = scalar_lea.hbm %s2853_s8, 1152 }
 0x55c   : > { %p2132_p3 = scmp.ne.s32.totalorder %s2744_s29, %s2131_s21  ;;  %p2136_p7 = scmp.lt.u32.totalorder %s2744_s29, %s2853_s8 }
 0x55d   : > { %p2137_p9 = scmp.lt.u32.totalorder %s2135_s24, %s2131_s21  ;;  %p2139_p8 = scmp.lt.u32.totalorder %s2131_s21, %s2744_s29 }
 0x55e   : > { %p2133_p4 = pnand %p2132_p3, %p2854_p1 }
 0x55f   : > { %p2138_p0 = por %p2137_p9, %p2136_p7 }
 0x560   : > { %p2134_p13 = pneg %p2133_p4 }
 0x561   : > { %p2140_p12 = por %p2139_p8, %p2138_p0 }
 0x563   : > { %p2141_p11 = pnand %p2140_p12, %p2134_p13 }
 0x565   : > { %2144 = shalt.err (!%p2141_p11)
}
 0x566   : > { %s2223_s15 = smov 128   ;;  %s2224_s20 = smov 8  }
 0x567   : > { %1841 = dma.vmem_to_hbm [thread:$0]  (%p2854_p1), %s2746_s30, 384, %s2744_s29, %s1375_s12, %s2223_s15, %s2223_s15, %s2224_s20  }
 0x568 PF: > { %s2855_s17 = sld [smem:[#allocation22_spill]]  ;;  %s2856_s3 = sld [smem:[#allocation20_spill]] }
 0x569   : > { %s2857_s1 = sld [smem:[#allocation26_spill]] }
 0x56e   : > { %p1867_p10 = scmp.ge.s32.totalorder %s2855_s17, 2  ;;  %s1405_s27 = sand.u32 1, %s2856_s3  }
 0x56f   : > { %p2858_p5 = scmp.ne.s32.totalorder %s2857_s1, 0  ;;  %s1406_s26 = scalar_lea.sflag [#allocation5], %s1405_s27 }
 0x571   : > { %p1863_p6 = pnand %p1867_p10, %p2858_p5 }
 0x573   : > { %2186 = dma.done.wait (!%p1863_p6), %s1406_s26, 384  }
 0x574   : > { %2188 = vsyncadd (!%p1863_p6), %s1406_s26, 4294966912  ;;  %s34_s14 = sadd.s32 1, %s2855_s17   ;;  %s2859_s23 = sld [smem:[#allocation21_spill]] }
 0x575   : > { %p31_p2 = scmp.ge.s32.totalorder %s34_s14, 5   ;;  %s2860_s11 = sld [smem:[#allocation25_spill]] }
 0x576   : > { %s2861_s16 = sld [smem:[#allocation23_spill]]  ;;  %s2862_s30 = smov %s2195_s10 }
 0x577   : > { %s2864_s12 = smov %s2207_s13  ;;  %33 = sbr.rel (!%p31_p2) target bundleno = 17 (0x11), region = 183 }
 0x57a   : > { %s2863_s10 = smov %s2859_s23 }
 0x57c   : > { %s2865_s13 = smov %s2861_s16 }
 0x57e   :  { %1411 = vsyncpa [#allocation4], 1 }
 0x57f   :  { %1413 = vsyncpa [#allocation4 + $0x1], 1 }
 0x580   :  { %1414 = vsyncpa [#allocation7], 1 }
 0x581   :  { %1416 = vsyncpa [#allocation7 + $0x1], 1 }
 0x582   :  { %1417 = vsyncpa [#allocation10], 1 }
 0x583   :  { %1419 = vsyncpa [#allocation10 + $0x1], 1 }
 0x584   :  { %1420 = vsyncpa [#allocation13], 1 }
 0x585   :  { %1422 = vsyncpa [#allocation13 + $0x1], 1 }
 0x586   :  { %1423 = vsyncpa [#allocation5], 1 }
 0x587   :  { %1425 = vsyncpa [#allocation5 + $0x1], 1 }

</bundles_post_ra>
